<compile_context>
chip_gen: v5e
topology: v5e:2x2
jax: 0.10.0
libtpu: 0.0.40
codegen_flags: <defaults>
</compile_context>

<pallas_src>
import math
import jax
import jax.numpy as jnp
from jax.experimental import pallas as pl
from jax.experimental.pallas import tpu as pltpu

SQRT_HALF = math.sqrt(0.5)
LANE = 128


def _round_up(n, m):
    return (n + m - 1) // m * m


def _pad_axis(x, axis, new_size):
    pad = new_size - x.shape[axis]
    if pad == 0:
        return x
    widths = [(0, 0)] * x.ndim
    widths[axis] = (0, pad)
    return jnp.pad(x, widths)


# ------------------------------- fused kernel --------------------------------

def _encoder_kernel(src_ref, emb_w_ref, start_w_ref, start_b_ref,
                    wa_ref, wg_ref, ba_ref, bg_ref, end_w_ref, end_b_ref,
                    o_ref, emb_s, h_s):
    """grid = (B, n_layers); one batch element per b, GLU layers stream on l."""
    l = pl.program_id(1)
    n_layers = pl.num_programs(1)
    T, _ = h_s.shape

    # ---- prologue (layer 0): src_word_emb (no bias) + start_fc -> VMEM ------
    @pl.when(l == 0)
    def _prologue():
        src = src_ref[0]                                           # (T, Cin_p) f32
        emb = jnp.dot(src.astype(jnp.bfloat16), emb_w_ref[...],
                      preferred_element_type=jnp.float32)          # (T, d_p) f32
        emb_s[...] = emb
        h = jnp.dot(emb.astype(jnp.bfloat16), start_w_ref[...],
                    preferred_element_type=jnp.float32) + start_b_ref[...]
        h_s[...] = h

    # ---- GLU block for layer `l` (this layer's weights streamed in) ---------
    x = h_s[...]                                                   # (T, C_p) f32
    row = jax.lax.broadcasted_iota(jnp.int32, x.shape, 0)
    # k=3 same-padded conv taps via XLU roll + one-row masks; pack the taps
    # along the contraction axis -> (T, 3*C_p) so one bf16 matmul per half.
    x_prev = jnp.where(row == 0, 0.0, pltpu.roll(x, shift=1, axis=0))
    x_next = jnp.where(row == T - 1, 0.0, pltpu.roll(x, shift=T - 1, axis=0))
    staged = jnp.concatenate([x_prev, x, x_next],
                             axis=1).astype(jnp.bfloat16)          # (T, 3C_p)
    a = jnp.dot(staged, wa_ref[0],
                preferred_element_type=jnp.float32) + ba_ref[0]    # (T, C_p)
    g = jnp.dot(staged, wg_ref[0],
                preferred_element_type=jnp.float32) + bg_ref[0]    # (T, C_p)
    h_new = (a * jax.nn.sigmoid(g) + x) * jnp.float32(SQRT_HALF)   # f32 tail
    h_s[...] = h_new

    # ---- epilogue (last layer): end_fc + emb residual, one HBM store --------
    @pl.when(l == n_layers - 1)
    def _epilogue():
        out = (jnp.dot(h_new.astype(jnp.bfloat16), end_w_ref[...],
                       preferred_element_type=jnp.float32)
               + end_b_ref[...] + emb_s[...]) * jnp.float32(SQRT_HALF)
        o_ref[0] = out.astype(o_ref.dtype)


# ------------------------------- wrapper --------------------------------------

def encoder_forward(params, src_seq):
    """src_seq: (B, T, input_channel) f32 -> (B, T, d_word_vec) f32."""
    B, T, Cin = src_seq.shape
    d = params["emb_w"].shape[1]
    C = params["start_w"].shape[1]
    L = len(params["glu"])

    Cin_p = _round_up(Cin, LANE)
    d_p = _round_up(d, LANE)
    C_p = _round_up(C, LANE)

    f32, bf16 = jnp.float32, jnp.bfloat16

    src_p = _pad_axis(src_seq.astype(f32), 2, Cin_p)               # (B, T, Cin_p)

    emb_w = _pad_axis(_pad_axis(params["emb_w"], 0, Cin_p), 1, d_p).astype(bf16)
    start_w = _pad_axis(_pad_axis(params["start_w"], 0, d_p), 1, C_p).astype(bf16)
    start_b = _pad_axis(params["start_b"], 0, C_p).reshape(1, C_p).astype(f32)
    end_w = _pad_axis(_pad_axis(params["end_w"], 0, C_p), 1, d_p).astype(bf16)
    end_b = _pad_axis(params["end_b"], 0, d_p).reshape(1, d_p).astype(f32)

    # Per-layer GLU conv weights, split into value/gate halves and packed along
    # the contraction axis (tap-major): (L, 3*C_p, C_p) each.
    wa_l, wg_l, ba_l, bg_l = [], [], [], []
    for (w, b) in params["glu"]:                                   # w: (3, C, 2C)
        wa = _pad_axis(_pad_axis(w[:, :, :C], 1, C_p), 2, C_p)     # (3, C_p, C_p)
        wg = _pad_axis(_pad_axis(w[:, :, C:], 1, C_p), 2, C_p)
        wa_l.append(wa.reshape(3 * C_p, C_p))
        wg_l.append(wg.reshape(3 * C_p, C_p))
        ba_l.append(_pad_axis(b[:C], 0, C_p))
        bg_l.append(_pad_axis(b[C:], 0, C_p))
    wa_all = jnp.stack(wa_l).astype(bf16)                          # (L, 3C_p, C_p)
    wg_all = jnp.stack(wg_l).astype(bf16)
    ba_all = jnp.stack(ba_l).reshape(L, 1, C_p).astype(f32)
    bg_all = jnp.stack(bg_l).reshape(L, 1, C_p).astype(f32)

    out_p = pl.pallas_call(
        _encoder_kernel,
        out_shape=jax.ShapeDtypeStruct((B, T, d_p), f32),
        grid_spec=pltpu.PrefetchScalarGridSpec(
            num_scalar_prefetch=0,
            grid=(B, L),
            in_specs=[
                pl.BlockSpec((1, T, Cin_p), lambda b, l: (b, 0, 0)),      # src
                pl.BlockSpec((Cin_p, d_p), lambda b, l: (0, 0)),          # emb_w
                pl.BlockSpec((d_p, C_p), lambda b, l: (0, 0)),            # start_w
                pl.BlockSpec((1, C_p), lambda b, l: (0, 0)),              # start_b
                pl.BlockSpec((1, 3 * C_p, C_p), lambda b, l: (l, 0, 0)),  # wa (streamed)
                pl.BlockSpec((1, 3 * C_p, C_p), lambda b, l: (l, 0, 0)),  # wg (streamed)
                pl.BlockSpec((1, 1, C_p), lambda b, l: (l, 0, 0)),        # ba
                pl.BlockSpec((1, 1, C_p), lambda b, l: (l, 0, 0)),        # bg
                pl.BlockSpec((C_p, d_p), lambda b, l: (0, 0)),            # end_w
                pl.BlockSpec((1, d_p), lambda b, l: (0, 0)),              # end_b
            ],
            out_specs=pl.BlockSpec((1, T, d_p), lambda b, l: (b, 0, 0)),
            scratch_shapes=[pltpu.VMEM((T, d_p), f32),     # emb (final residual)
                            pltpu.VMEM((T, C_p), f32)]),   # GLU activation
        compiler_params=pltpu.CompilerParams(
            dimension_semantics=("parallel", "arbitrary"),
            vmem_limit_bytes=32 * 1024 * 1024),
    )(src_p, emb_w, start_w, start_b, wa_all, wg_all, ba_all, bg_all,
      end_w, end_b)
    return out_p[:, :, :d]


# ------------------------------ reference -------------------------------------

def encoder_ref(params, x):
    emb = x @ params["emb_w"]
    h = emb @ params["start_w"] + params["start_b"]
    for (w, b) in params["glu"]:
        xp = jnp.pad(h, ((0, 0), (1, 1), (0, 0)))
        y = (jnp.einsum("btc,cd->btd", xp[:, :-2], w[0])
             + jnp.einsum("btc,cd->btd", xp[:, 1:-1], w[1])
             + jnp.einsum("btc,cd->btd", xp[:, 2:], w[2]) + b)
        a, gte = jnp.split(y, 2, axis=-1)
        h = (a * jax.nn.sigmoid(gte) + h) * SQRT_HALF
    out = h @ params["end_w"] + params["end_b"]
    return (out + emb) * SQRT_HALF


# --------------------------------- main ----------------------------------------

def init_params(key, input_channel, d_word_vec, glu_channel, n_layers):
    ks = jax.random.split(key, 4 + 2 * n_layers)
    p = {
        "emb_w": jax.random.normal(ks[0], (input_channel, d_word_vec),
                                   jnp.float32) * 0.1,
        "start_w": jax.random.normal(ks[1], (d_word_vec, glu_channel),
                                     jnp.float32) * 0.1,
        "start_b": jax.random.normal(ks[2], (glu_channel,), jnp.float32) * 0.01,
        "end_w": jax.random.normal(ks[3], (glu_channel, d_word_vec),
                                   jnp.float32) * 0.1,
        "end_b": jnp.zeros((d_word_vec,), jnp.float32),
        "glu": [],
    }
    for i in range(n_layers):
        w = jax.random.normal(ks[4 + 2 * i], (3, glu_channel, 2 * glu_channel),
                              jnp.float32) * 0.1
        b = jax.random.normal(ks[5 + 2 * i], (2 * glu_channel,),
                              jnp.float32) * 0.01
        p["glu"].append((w, b))
    return p


if __name__ == "__main__":
    B, T = 2, 8
    input_channel, d_word_vec, glu_channel, n_layers = 4, 32, 32, 2

    key = jax.random.PRNGKey(0)
    k_param, k_in = jax.random.split(key)
    params = init_params(k_param, input_channel, d_word_vec, glu_channel,
                         n_layers)
    src_seq = jax.random.normal(k_in, (B, T, input_channel), jnp.float32)

    out = jax.jit(encoder_forward)(params, src_seq)
    out = jax.block_until_ready(out)

    ref = encoder_ref(params, src_seq)
    assert out.shape == (B, T, d_word_vec)
    # bf16 MXU operands with f32 accumulation -> loosened tolerance vs f32 ref.
    assert jnp.allclose(out, ref, atol=2e-2, rtol=2e-2), \
        float(jnp.max(jnp.abs(out - ref)))
    print("KERNEL_OK")
</pallas_src>

<mosaic_0001>
module attributes {stable_mosaic.version = 11 : i64} {
  func.func @_encoder_kernel(%arg0: i32, %arg1: i32, %arg2: memref<1x8x128xf32, #tpu.memory_space<vmem>>, %arg3: memref<128x128xbf16, #tpu.memory_space<vmem>>, %arg4: memref<128x128xbf16, #tpu.memory_space<vmem>>, %arg5: memref<1x128xf32, #tpu.memory_space<vmem>>, %arg6: memref<1x384x128xbf16, #tpu.memory_space<vmem>>, %arg7: memref<1x384x128xbf16, #tpu.memory_space<vmem>>, %arg8: memref<1x1x128xf32, #tpu.memory_space<vmem>>, %arg9: memref<1x1x128xf32, #tpu.memory_space<vmem>>, %arg10: memref<128x128xbf16, #tpu.memory_space<vmem>>, %arg11: memref<1x128xf32, #tpu.memory_space<vmem>>, %arg12: memref<1x8x128xf32, #tpu.memory_space<vmem>>, %arg13: memref<8x128xf32, #tpu.memory_space<vmem>>, %arg14: memref<8x128xf32, #tpu.memory_space<vmem>>) attributes {dimension_semantics = [#tpu.dimension_semantics<parallel>, #tpu.dimension_semantics<arbitrary>], iteration_bounds = array<i64: 2, 2>, scalar_prefetch = 0 : i64, scratch_operands = 2 : i64, tpu.core_type = #tpu.core_type<tc>, window_params = [{transform_indices = @transform_0, window_bounds = array<i64: 1, 8, 128>}, {pipeline_mode = #tpu.pipeline_mode<synchronous>, transform_indices = @transform_1, window_bounds = array<i64: 128, 128>}, {pipeline_mode = #tpu.pipeline_mode<synchronous>, transform_indices = @transform_2, window_bounds = array<i64: 128, 128>}, {pipeline_mode = #tpu.pipeline_mode<synchronous>, transform_indices = @transform_3, window_bounds = array<i64: 1, 128>}, {transform_indices = @transform_4, window_bounds = array<i64: 1, 384, 128>}, {transform_indices = @transform_5, window_bounds = array<i64: 1, 384, 128>}, {transform_indices = @transform_6, window_bounds = array<i64: 1, 1, 128>}, {transform_indices = @transform_7, window_bounds = array<i64: 1, 1, 128>}, {pipeline_mode = #tpu.pipeline_mode<synchronous>, transform_indices = @transform_8, window_bounds = array<i64: 128, 128>}, {pipeline_mode = #tpu.pipeline_mode<synchronous>, transform_indices = @transform_9, window_bounds = array<i64: 1, 128>}, {transform_indices = @transform_10, window_bounds = array<i64: 1, 8, 128>}]} {
    %c0_i32 = arith.constant 0 : i32
    %0 = arith.cmpi eq, %arg1, %c0_i32 : i32
    %1 = arith.extui %0 : i1 to i32
    %c0_i32_0 = arith.constant 0 : i32
    %2 = arith.cmpi ne, %1, %c0_i32_0 : i32
    scf.if %2 {
      %c0_25 = arith.constant 0 : index
      %c0_26 = arith.constant 0 : index
      %c0_27 = arith.constant 0 : index
      %44 = vector.load %arg2[%c0_25, %c0_26, %c0_27] : memref<1x8x128xf32, #tpu.memory_space<vmem>>, vector<1x8x128xf32>
      %45 = vector.shape_cast %44 : vector<1x8x128xf32> to vector<8x128xf32>
      %46 = arith.truncf %45 : vector<8x128xf32> to vector<8x128xbf16>
      %c0_28 = arith.constant 0 : index
      %c0_29 = arith.constant 0 : index
      %47 = vector.load %arg3[%c0_28, %c0_29] : memref<128x128xbf16, #tpu.memory_space<vmem>>, vector<128x128xbf16>
      %cst_30 = arith.constant dense<0.000000e+00> : vector<8x128xf32>
      %48 = tpu.matmul %46, %47, %cst_30 {dimension_numbers = #tpu.dot_dimension_numbers<[1], [0], [0], [1], [0, 0, 1, 1], [], []>} : vector<8x128xbf16>, vector<128x128xbf16>, vector<8x128xf32> -> vector<8x128xf32>
      %c0_31 = arith.constant 0 : index
      %c0_32 = arith.constant 0 : index
      %49 = vector.load %arg13[%c0_31, %c0_32] : memref<8x128xf32, #tpu.memory_space<vmem>>, vector<8x128xf32>
      tpu.vector_store %arg13[%c0_31, %c0_32], %48 {strides = array<i32>} : memref<8x128xf32, #tpu.memory_space<vmem>>, vector<8x128xf32>,
      %50 = arith.truncf %48 : vector<8x128xf32> to vector<8x128xbf16>
      %c0_33 = arith.constant 0 : index
      %c0_34 = arith.constant 0 : index
      %51 = vector.load %arg4[%c0_33, %c0_34] : memref<128x128xbf16, #tpu.memory_space<vmem>>, vector<128x128xbf16>
      %cst_35 = arith.constant dense<0.000000e+00> : vector<8x128xf32>
      %52 = tpu.matmul %50, %51, %cst_35 {dimension_numbers = #tpu.dot_dimension_numbers<[1], [0], [0], [1], [0, 0, 1, 1], [], []>} : vector<8x128xbf16>, vector<128x128xbf16>, vector<8x128xf32> -> vector<8x128xf32>
      %c0_36 = arith.constant 0 : index
      %c0_37 = arith.constant 0 : index
      %53 = vector.load %arg5[%c0_36, %c0_37] : memref<1x128xf32, #tpu.memory_space<vmem>>, vector<1x128xf32>
      %54 = vector.broadcast %53 : vector<1x128xf32> to vector<8x128xf32>
      %55 = arith.addf %52, %54 : vector<8x128xf32>
      %c0_38 = arith.constant 0 : index
      %c0_39 = arith.constant 0 : index
      %56 = vector.load %arg14[%c0_38, %c0_39] : memref<8x128xf32, #tpu.memory_space<vmem>>, vector<8x128xf32>
      tpu.vector_store %arg14[%c0_38, %c0_39], %55 {strides = array<i32>} : memref<8x128xf32, #tpu.memory_space<vmem>>, vector<8x128xf32>,
    } else {
    }
    %c0 = arith.constant 0 : index
    %c0_1 = arith.constant 0 : index
    %3 = vector.load %arg14[%c0, %c0_1] : memref<8x128xf32, #tpu.memory_space<vmem>>, vector<8x128xf32>
    %4 = tpu.iota {dimensions = array<i32: 0>} : vector<8x128xi32>
    %c0_i32_2 = arith.constant 0 : i32
    %5 = vector.broadcast %c0_i32_2 : i32 to vector<8x128xi32>
    %6 = arith.cmpi eq, %4, %5 : vector<8x128xi32>
    %c1_i32 = arith.constant 1 : i32
    %7 = tpu.dynamic_rotate %3 by %c1_i32 dim 0 : vector<8x128xf32>, i32 -> vector<8x128xf32>
    %cst = arith.constant 0.000000e+00 : f32
    %8 = vector.broadcast %cst : f32 to vector<8x128xf32>
    %9 = arith.select %6, %8, %7 : vector<8x128xi1>, vector<8x128xf32>
    %c7_i32 = arith.constant 7 : i32
    %10 = vector.broadcast %c7_i32 : i32 to vector<8x128xi32>
    %11 = arith.cmpi eq, %4, %10 : vector<8x128xi32>
    %c7_i32_3 = arith.constant 7 : i32
    %12 = tpu.dynamic_rotate %3 by %c7_i32_3 dim 0 : vector<8x128xf32>, i32 -> vector<8x128xf32>
    %cst_4 = arith.constant 0.000000e+00 : f32
    %13 = vector.broadcast %cst_4 : f32 to vector<8x128xf32>
    %14 = arith.select %11, %13, %12 : vector<8x128xi1>, vector<8x128xf32>
    %15 = tpu.concatenate %9, %3, %14 in 1 : vector<8x128xf32>, vector<8x128xf32>, vector<8x128xf32> -> vector<8x384xf32>
    %16 = arith.truncf %15 : vector<8x384xf32> to vector<8x384xbf16>
    %c0_5 = arith.constant 0 : index
    %c0_6 = arith.constant 0 : index
    %c0_7 = arith.constant 0 : index
    %17 = vector.load %arg6[%c0_5, %c0_6, %c0_7] : memref<1x384x128xbf16, #tpu.memory_space<vmem>>, vector<1x384x128xbf16>
    %18 = vector.shape_cast %17 : vector<1x384x128xbf16> to vector<384x128xbf16>
    %cst_8 = arith.constant dense<0.000000e+00> : vector<8x128xf32>
    %19 = tpu.matmul %16, %18, %cst_8 {dimension_numbers = #tpu.dot_dimension_numbers<[1], [0], [0], [1], [0, 0, 1, 1], [], []>} : vector<8x384xbf16>, vector<384x128xbf16>, vector<8x128xf32> -> vector<8x128xf32>
    %c0_9 = arith.constant 0 : index
    %c0_10 = arith.constant 0 : index
    %c0_11 = arith.constant 0 : index
    %20 = vector.load %arg8[%c0_9, %c0_10, %c0_11] : memref<1x1x128xf32, #tpu.memory_space<vmem>>, vector<1x1x128xf32>
    %21 = vector.shape_cast %20 : vector<1x1x128xf32> to vector<1x128xf32>
    %22 = vector.broadcast %21 : vector<1x128xf32> to vector<8x128xf32>
    %23 = arith.addf %19, %22 : vector<8x128xf32>
    %c0_12 = arith.constant 0 : index
    %c0_13 = arith.constant 0 : index
    %c0_14 = arith.constant 0 : index
    %24 = vector.load %arg7[%c0_12, %c0_13, %c0_14] : memref<1x384x128xbf16, #tpu.memory_space<vmem>>, vector<1x384x128xbf16>
    %25 = vector.shape_cast %24 : vector<1x384x128xbf16> to vector<384x128xbf16>
    %cst_15 = arith.constant dense<0.000000e+00> : vector<8x128xf32>
    %26 = tpu.matmul %16, %25, %cst_15 {dimension_numbers = #tpu.dot_dimension_numbers<[1], [0], [0], [1], [0, 0, 1, 1], [], []>} : vector<8x384xbf16>, vector<384x128xbf16>, vector<8x128xf32> -> vector<8x128xf32>
    %c0_16 = arith.constant 0 : index
    %c0_17 = arith.constant 0 : index
    %c0_18 = arith.constant 0 : index
    %27 = vector.load %arg9[%c0_16, %c0_17, %c0_18] : memref<1x1x128xf32, #tpu.memory_space<vmem>>, vector<1x1x128xf32>
    %28 = vector.shape_cast %27 : vector<1x1x128xf32> to vector<1x128xf32>
    %29 = vector.broadcast %28 : vector<1x128xf32> to vector<8x128xf32>
    %30 = arith.addf %26, %29 : vector<8x128xf32>
    %31 = arith.negf %30 : vector<8x128xf32>
    %32 = math.exp %31 : vector<8x128xf32>
    %cst_19 = arith.constant 1.000000e+00 : f32
    %33 = vector.broadcast %cst_19 : f32 to vector<8x128xf32>
    %34 = arith.addf %33, %32 : vector<8x128xf32>
    %35 = arith.divf %33, %34 : vector<8x128xf32>
    %36 = arith.mulf %23, %35 : vector<8x128xf32>
    %37 = arith.addf %36, %3 : vector<8x128xf32>
    %cst_20 = arith.constant 0.707106769 : f32
    %38 = vector.broadcast %cst_20 : f32 to vector<8x128xf32>
    %39 = arith.mulf %37, %38 : vector<8x128xf32>
    %c0_21 = arith.constant 0 : index
    %c0_22 = arith.constant 0 : index
    %40 = vector.load %arg14[%c0_21, %c0_22] : memref<8x128xf32, #tpu.memory_space<vmem>>, vector<8x128xf32>
    tpu.vector_store %arg14[%c0_21, %c0_22], %39 {strides = array<i32>} : memref<8x128xf32, #tpu.memory_space<vmem>>, vector<8x128xf32>,
    %c1_i32_23 = arith.constant 1 : i32
    %41 = arith.cmpi eq, %arg1, %c1_i32_23 : i32
    %42 = arith.extui %41 : i1 to i32
    %c0_i32_24 = arith.constant 0 : i32
    %43 = arith.cmpi ne, %42, %c0_i32_24 : i32
    scf.if %43 {
      %44 = arith.truncf %39 : vector<8x128xf32> to vector<8x128xbf16>
      %c0_25 = arith.constant 0 : index
      %c0_26 = arith.constant 0 : index
      %45 = vector.load %arg10[%c0_25, %c0_26] : memref<128x128xbf16, #tpu.memory_space<vmem>>, vector<128x128xbf16>
      %cst_27 = arith.constant dense<0.000000e+00> : vector<8x128xf32>
      %46 = tpu.matmul %44, %45, %cst_27 {dimension_numbers = #tpu.dot_dimension_numbers<[1], [0], [0], [1], [0, 0, 1, 1], [], []>} : vector<8x128xbf16>, vector<128x128xbf16>, vector<8x128xf32> -> vector<8x128xf32>
      %c0_28 = arith.constant 0 : index
      %c0_29 = arith.constant 0 : index
      %47 = vector.load %arg11[%c0_28, %c0_29] : memref<1x128xf32, #tpu.memory_space<vmem>>, vector<1x128xf32>
      %48 = vector.broadcast %47 : vector<1x128xf32> to vector<8x128xf32>
      %49 = arith.addf %46, %48 : vector<8x128xf32>
      %c0_30 = arith.constant 0 : index
      %c0_31 = arith.constant 0 : index
      %50 = vector.load %arg13[%c0_30, %c0_31] : memref<8x128xf32, #tpu.memory_space<vmem>>, vector<8x128xf32>
      %51 = arith.addf %49, %50 : vector<8x128xf32>
      %cst_32 = arith.constant 0.707106769 : f32
      %52 = vector.broadcast %cst_32 : f32 to vector<8x128xf32>
      %53 = arith.mulf %51, %52 : vector<8x128xf32>
      %c0_33 = arith.constant 0 : index
      %c0_34 = arith.constant 0 : index
      %c0_35 = arith.constant 0 : index
      %54 = vector.load %arg12[%c0_33, %c0_34, %c0_35] : memref<1x8x128xf32, #tpu.memory_space<vmem>>, vector<1x8x128xf32>
      %55 = vector.shape_cast %54 : vector<1x8x128xf32> to vector<8x128xf32>
      %56 = vector.shape_cast %53 : vector<8x128xf32> to vector<1x8x128xf32>
      tpu.vector_store %arg12[%c0_33, %c0_34, %c0_35], %56 {strides = array<i32>} : memref<1x8x128xf32, #tpu.memory_space<vmem>>, vector<1x8x128xf32>,
    } else {
    }
    return
  }
  func.func @transform_0(%arg0: i32, %arg1: i32) -> (i32, i32, i32) {
    %c0_i32 = arith.constant 0 : i32
    %c0_i32_0 = arith.constant 0 : i32
    %c0_i32_1 = arith.constant 0 : i32
    return %arg0, %c0_i32, %c0_i32_0 : i32, i32, i32
  }
  func.func @transform_1(%arg0: i32, %arg1: i32) -> (i32, i32) {
    %c0_i32 = arith.constant 0 : i32
    %c0_i32_0 = arith.constant 0 : i32
    %c0_i32_1 = arith.constant 0 : i32
    return %c0_i32, %c0_i32_0 : i32, i32
  }
  func.func @transform_2(%arg0: i32, %arg1: i32) -> (i32, i32) {
    %c0_i32 = arith.constant 0 : i32
    %c0_i32_0 = arith.constant 0 : i32
    %c0_i32_1 = arith.constant 0 : i32
    return %c0_i32, %c0_i32_0 : i32, i32
  }
  func.func @transform_3(%arg0: i32, %arg1: i32) -> (i32, i32) {
    %c0_i32 = arith.constant 0 : i32
    %c0_i32_0 = arith.constant 0 : i32
    %c0_i32_1 = arith.constant 0 : i32
    return %c0_i32, %c0_i32_0 : i32, i32
  }
  func.func @transform_4(%arg0: i32, %arg1: i32) -> (i32, i32, i32) {
    %c0_i32 = arith.constant 0 : i32
    %c0_i32_0 = arith.constant 0 : i32
    %c0_i32_1 = arith.constant 0 : i32
    return %arg1, %c0_i32, %c0_i32_0 : i32, i32, i32
  }
  func.func @transform_5(%arg0: i32, %arg1: i32) -> (i32, i32, i32) {
    %c0_i32 = arith.constant 0 : i32
    %c0_i32_0 = arith.constant 0 : i32
    %c0_i32_1 = arith.constant 0 : i32
    return %arg1, %c0_i32, %c0_i32_0 : i32, i32, i32
  }
  func.func @transform_6(%arg0: i32, %arg1: i32) -> (i32, i32, i32) {
    %c0_i32 = arith.constant 0 : i32
    %c0_i32_0 = arith.constant 0 : i32
    %c0_i32_1 = arith.constant 0 : i32
    return %arg1, %c0_i32, %c0_i32_0 : i32, i32, i32
  }
  func.func @transform_7(%arg0: i32, %arg1: i32) -> (i32, i32, i32) {
    %c0_i32 = arith.constant 0 : i32
    %c0_i32_0 = arith.constant 0 : i32
    %c0_i32_1 = arith.constant 0 : i32
    return %arg1, %c0_i32, %c0_i32_0 : i32, i32, i32
  }
  func.func @transform_8(%arg0: i32, %arg1: i32) -> (i32, i32) {
    %c0_i32 = arith.constant 0 : i32
    %c0_i32_0 = arith.constant 0 : i32
    %c0_i32_1 = arith.constant 0 : i32
    return %c0_i32, %c0_i32_0 : i32, i32
  }
  func.func @transform_9(%arg0: i32, %arg1: i32) -> (i32, i32) {
    %c0_i32 = arith.constant 0 : i32
    %c0_i32_0 = arith.constant 0 : i32
    %c0_i32_1 = arith.constant 0 : i32
    return %c0_i32, %c0_i32_0 : i32, i32
  }
  func.func @transform_10(%arg0: i32, %arg1: i32) -> (i32, i32, i32) {
    %c0_i32 = arith.constant 0 : i32
    %c0_i32_0 = arith.constant 0 : i32
    %c0_i32_1 = arith.constant 0 : i32
    return %arg0, %c0_i32, %c0_i32_0 : i32, i32, i32
  }
}

</mosaic_0001>

<bundles_post_ra>
// kernel: encoder_forward.1
= control target key start
LH: loop header
LB: loop body
LE: loop exit
PB: predicated region body
PF: predicated region fallthrough
CT: control target
= control target key end

     0   :  { %s2269_s0 = inlined_call_operand.vmem [shape: f32[2,8,128], index: 0, kind: input, shape index: {}]   ;;  %s2270_s1 = inlined_call_operand.vmem [shape: bf16[128,128], index: 1, kind: input, shape index: {}]   ;;  %s2271_s2 = inlined_call_operand.vmem [shape: bf16[128,128], index: 2, kind: input, shape index: {}]   ;;  %s2272_s3 = inlined_call_operand.vmem [shape: f32[1,128], index: 3, kind: input, shape index: {}]   ;;  %s2273_s4 = inlined_call_operand.vmem [shape: bf16[2,384,128], index: 4, kind: input, shape index: {}]   ;;  %s2274_s5 = inlined_call_operand.vmem [shape: bf16[2,384,128], index: 5, kind: input, shape index: {}]   ;;  %s2275_s6 = inlined_call_operand.vmem [shape: f32[2,1,128], index: 6, kind: input, shape index: {}]   ;;  %s2276_s7 = inlined_call_operand.vmem [shape: f32[2,1,128], index: 7, kind: input, shape index: {}]   ;;  %s2277_s8 = inlined_call_operand.vmem [shape: bf16[128,128], index: 8, kind: input, shape index: {}]   ;;  %s2278_s9 = inlined_call_operand.vmem [shape: f32[1,128], index: 9, kind: input, shape index: {}]   ;;  %s2279_s10 = inlined_call_operand.hbm [shape: f32[2,8,128], index: 10, kind: output, shape index: {}]  }
   0x1   :  { %2292 = sst [smem:[#allocation17_spill]] %s2279_s10 }
   0x2   :  { %15 = vsyncpa [#allocation5], 0 }
   0x3   :  { %17 = vsyncpa [#allocation5 + $0x1], 0  ;;  %s1954_s13 = smov 0   ;;  %s1956_s14 = smov 0  }
   0x4   :  { %s1958_s15 = smov 0   ;;  %s1960_s16 = smov 0  }
   0x5   :  { %s1962_s17 = smov 0   ;;  %s1964_s18 = smov 0  }
   0x6   :  { %s1966_s19 = smov 0   ;;  %s1968_s20 = smov 0  }
   0x7 LB: > { %2293 = sst [smem:[#allocation7_spill]] %s1869_s13  ;;  %s1325_s21 = sadd.s32 4294967295, %s1897_s20   ;;  %s1897_s20 = sphi %s1968_s20, %s23_s20   ;;  %s1893_s19 = sphi %s1966_s19, %s2320_s19   ;;  %s1889_s18 = sphi %s1964_s18, %s2319_s18   ;;  %s1885_s17 = sphi %s1962_s17, %s2318_s17   ;;  %s1881_s16 = sphi %s1960_s16, %s2317_s16   ;;  %s1877_s15 = sphi %s1958_s15, %s2316_s15   ;;  %s1873_s14 = sphi %s1956_s14, %s2322_s14   ;;  %s1869_s13 = sphi %s1954_s13, %s2321_s13  }
   0x8   : > { %2294 = sst [smem:[#allocation8_spill]] %s1877_s15  ;;  %s1326_s22 = sadd.s32 4294967294, %s1897_s20  }
   0x9   : > { %2295 = sst [smem:[#allocation9_spill]] %s1889_s18  ;;  %s32_s23 = sadd.s32 1, %s1889_s18 }
   0xa   : > { %2296 = sst [smem:[#allocation10_spill]] %s1893_s19  ;;  %p33_p0 = scmp.ge.s32.totalorder %s32_s23, 2 }
   0xb   : > { %2297 = sst [smem:[#allocation11_spill]] %s1897_s20  ;;  %s35_s24 = sadd.s32 1, %s1893_s19 }
   0xc   : > { %p287_p1 = scmp.ne.s32.totalorder %s1877_s15, %s1873_s14  ;;  %p288_p2 = scmp.eq.s32.totalorder %s1325_s21, 3 }
   0xd   : > { %s2324_s23 = smov (%p33_p0, %s32_s23), 0  ;;  %s2326_s24 = smov (!%p33_p0, %s35_s24), %s1893_s19 }
   0xe   : > { %2298 = sst [smem:[#allocation12_spill]] %s2324_s23  ;;  %p2003_p3 = por %p288_p2, %p287_p1 }
   0xf   : > { %p293_p4 = scmp.ne.s32.totalorder %s1873_s14, %s1869_s13  ;;  %p37_p5 = scmp.ge.s32.totalorder %s2326_s24, 2 }
  0x10   : > { %s2299_s25 = scalar_select %p2003_p3, 1, 0 }
  0x11   : > { %p294_p6 = scmp.eq.s32.totalorder %s1326_s22, 3  ;;  %p1329_p7 = scmp.ge.s32.totalorder %s1897_s20, 1 }
  0x12   : > { %2300 = sst [smem:[#allocation13_spill]] %s2299_s25  ;;  %p362_p8 = scmp.lt.s32.totalorder %s1897_s20, 5 }
  0x13   : > { %s2328_s24 = smov (%p37_p5, %s2326_s24), 0  ;;  %p2013_p9 = por %p294_p6, %p293_p4 }
  0x14   : > { %2301 = sst [smem:[#allocation14_spill]] %s2328_s24  ;;  %p363_p10 = pnand %p1329_p7, %p362_p8 }
  0x15   : > { %s2302_s26 = scalar_select %p2013_p9, 1, 0 }
  0x16   : > { %s274_s27 = ssub.s32 %s1893_s19, %s2328_s24  ;;  %s277_s28 = sadd.s32 1, %s1877_s15 }
  0x17   : > { %2303 = sst [smem:[#allocation15_spill]] %s2302_s26  ;;  %p275_p11 = scmp.eq.s32.totalorder %s274_s27, 0 }
  0x18   : > { %366 = sbr.rel (%p363_p10) target bundleno = 745 (0x2e9), region = 60  ;;  %s2283_s30 = sand.u32 (!%p363_p10), 1, %s1873_s14  }
  0x19   : > { %s2021_s29 = scalar_select %p275_p11, %s1877_s15, %s277_s28  }
  0x1a   : > { %p415_p12 = scmp.lt.s32.totalorder (!%p363_p10), %s1885_s17, 1  ;;  %s2027_s11 = sshll.u32 (!%p363_p10), %s2283_s30, 3 }
  0x1b   : > { %2304 = sst [smem:[#allocation16_spill]] %s2021_s29  ;;  %p419_p13 = scmp.lt.s32.totalorder (!%p363_p10), %s1881_s16, 1 }
  0x1c   : > { %p1334_p0 = scmp.ne.s32.totalorder (!%p363_p10), %s1881_s16, 0 }
  0x1d   : > { %s416_s12 = scalar_select %p415_p12, %s1885_s17, 1 }
  0x1e   : > { %s2032_s21 = scalar_select %p419_p13, %s1881_s16, 1 }
  0x1f   : > { %s1331_s22 = sshll.u32 %s416_s12, 3  ;;  %438 = sbr.rel (%p1334_p0) target bundleno = 330 (0x14a), region = 64 }
  0x20   : > { %s2037_s24 = scalar_lea.vmem %s2269_s0, %s1331_s22  ;;  %s1723_s23 = smul.u32 192, %s2032_s21 }
  0x21   : > { %s431_s30 = scalar_lea.vmem %s2275_s6, %s2032_s21  ;;  %s434_s26 = scalar_lea.vmem %s2276_s7, %s2032_s21 }
  0x22   : > { %s2051_s10 = scalar_lea.vmem %s2273_s4, %s1723_s23  ;;  %s2056_s27 = scalar_lea.vmem %s2274_s5, %s1723_s23 }
  0x23   : > { %s414_s22 = scalar_lea.vmem [#allocation4], %s2027_s11 }
  0x24   : > { %v1656_v0 = vld [vmem:[%s2270_s1 + $0x38] sm:$0xff]  ;;  %v1655_v1 = vld [vmem:[%s2270_s1 + $0x30] sm:$0xff]  ;;  %v1654_v4 = vld [vmem:[%s2270_s1 + $0x28] sm:$0xff] }
  0x25   : > { %505 = vmatpush.bf16.msra.mxu0 %v1656_v0  ;;  %v1664_v2 = vld [vmem:[%s2271_s2 + $0x38] sm:$0xff]  ;;  %v1663_v3 = vld [vmem:[%s2271_s2 + $0x30] sm:$0xff]  ;;  %v1662_v5 = vld [vmem:[%s2271_s2 + $0x28] sm:$0xff] }
  0x26   : > { %588 = vmatpush.bf16.msra.mxu1 %v1664_v2  ;;  %v1653_v6 = vld [vmem:[%s2270_s1 + $0x20] sm:$0xff]  ;;  %v1652_v8 = vld [vmem:[%s2270_s1 + $0x18] sm:$0xff]  ;;  %v1651_v10 = vld [vmem:[%s2270_s1 + $0x10] sm:$0xff] }
  0x27   : > { %v1661_v7 = vld [vmem:[%s2271_s2 + $0x20] sm:$0xff]  ;;  %v1660_v9 = vld [vmem:[%s2271_s2 + $0x18] sm:$0xff]  ;;  %v1659_v11 = vld [vmem:[%s2271_s2 + $0x10] sm:$0xff] }
  0x28   : > { %v1650_v12 = vld [vmem:[%s2270_s1 + $0x8] sm:$0xff]  ;;  %v1649_v14 = vld [vmem:[%s2270_s1] sm:$0xff] }
  0x29   : > { %506 = vmatpush.bf16.msra.mxu0 %v1655_v1  ;;  %v1658_v13 = vld [vmem:[%s2271_s2 + $0x8] sm:$0xff]  ;;  %v439_v15 = vld [vmem:[%s2037_s24] sm:$0xff] }
  0x2a   : > { %589 = vmatpush.bf16.msra.mxu1 %v1663_v3  ;;  %v440_v16 = vpack.c.bf16 %v439_v15, %v439_v15  ;;  %v1657_v17 = vld [vmem:[%s2271_s2] sm:$0xff] }
  0x2b   : > { %v1795_v21 = vld [vmem:[%s2272_s3] ss:$0 sm:$0xff] }
  0x2d   : > { %507 = vmatpush.bf16.msra.mxu0 %v1654_v4 }
  0x2e   : > { %590 = vmatpush.bf16.msra.mxu1 %v1662_v5 }
  0x31   : > { %508 = vmatpush.bf16.msra.mxu0 %v1653_v6 }
  0x32   : > { %591 = vmatpush.bf16.msra.mxu1 %v1661_v7 }
  0x35   : > { %509 = vmatpush.bf16.msra.mxu0 %v1652_v8 }
  0x36   : > { %592 = vmatpush.bf16.msra.mxu1 %v1660_v9 }
  0x39   : > { %510 = vmatpush.bf16.msra.mxu0 %v1651_v10 }
  0x3a   : > { %593 = vmatpush.bf16.msra.mxu1 %v1659_v11 }
  0x3d   : > { %511 = vmatpush.bf16.msra.mxu0 %v1650_v12 }
  0x3e   : > { %594 = vmatpush.bf16.msra.mxu1 %v1658_v13 }
  0x41   : > { %512 = vmatpush.bf16.msra.mxu0 %v1649_v14 }
  0x42   : > { %595 = vmatpush.bf16.msra.mxu1 %v1657_v17 }
  0x44   : > { %513 = vmatmul.bf16.vlgmr.msra.gmra.mxu0 %v440_v16 }
  0xc1   : > { %v514_v18 = vpop.f32.mrf.mxu0 }
  0xc2   : > { %518 = vst [vmem:[#allocation2] sm:$0xff] %v514_v18  ;;  %v519_v19 = vpack.c.bf16 %v514_v18, %v514_v18 }
  0xc4   : > { %596 = vmatmul.bf16.vlgmr.msra.gmra.mxu1 %v519_v19 }
  0xc9   : > { %v516_v20 = vpop.f32.mrf.mxu0 }
 0x141   : > { %v597_v22 = vpop.f32.mrf.mxu1 }
 0x142   : > { %v598_v23 = vadd.f32 %v1795_v21, %v597_v22 }
 0x144   : > { %601 = vst [vmem:[#allocation3] sm:$0xff] %v598_v23 }
 0x149   : > { %v599_v24 = vpop.f32.mrf.mxu1 }
 0x14a PF: > { %v1672_v25 = vld [vmem:[%s2051_s10 + $0x38] sm:$0xff]  ;;  %v1671_v27 = vld [vmem:[%s2051_s10 + $0x30] sm:$0xff]  ;;  %v1670_v33 = vld [vmem:[%s2051_s10 + $0x28] sm:$0xff]  ;;  %v603_v47 = vlaneseq  ;;  %p1612_p1 = scmp.ne.s32.totalorder %s1881_s16, 1 }
 0x14b   : > { %v1680_v26 = vld [vmem:[%s2051_s10 + $0x78] sm:$0xff]  ;;  %810 = vmatpush.bf16.msra.mxu0 %v1672_v25  ;;  %v1679_v28 = vld [vmem:[%s2051_s10 + $0x70] sm:$0xff]  ;;  %v1678_v34 = vld [vmem:[%s2051_s10 + $0x68] sm:$0xff] }
 0x14c   : > { %823 = vmatpush.bf16.msra.mxu1 %v1680_v26  ;;  %v1688_v29 = vld [vmem:[%s2051_s10 + $0xb8] sm:$0xff]  ;;  %v1687_v31 = vld [vmem:[%s2051_s10 + $0xb0] sm:$0xff]  ;;  %v1686_v35 = vld [vmem:[%s2051_s10 + $0xa8] sm:$0xff]  ;;  %v604_v53 = vshrl.u32 %v603_v47, 7 }
 0x14d   : > { %v1696_v30 = vld [vmem:[%s2056_s27 + $0x38] sm:$0xff]  ;;  %836 = vmatpush.bf16.msra.mxu2 %v1688_v29  ;;  %v1695_v32 = vld [vmem:[%s2056_s27 + $0x30] sm:$0xff]  ;;  %v1694_v36 = vld [vmem:[%s2056_s27 + $0x28] sm:$0xff] }
 0x14e   : > { %1045 = vmatpush.bf16.msra.mxu3 %v1696_v30  ;;  %v1669_v37 = vld [vmem:[%s2051_s10 + $0x20] sm:$0xff]  ;;  %v1668_v41 = vld [vmem:[%s2051_s10 + $0x18] sm:$0xff]  ;;  %v1667_v45 = vld [vmem:[%s2051_s10 + $0x10] sm:$0xff]  ;;  %vm1721_vm0 = vcmp.ne.s32.totalorder %v604_v53, 0  ;;  %vm1722_vm2 = vcmp.ne.s32.totalorder %v604_v53, 7 }
 0x14f   : > { %811 = vmatpush.bf16.msra.mxu0 %v1671_v27  ;;  %v1677_v38 = vld [vmem:[%s2051_s10 + $0x60] sm:$0xff]  ;;  %v1676_v42 = vld [vmem:[%s2051_s10 + $0x58] sm:$0xff]  ;;  %v1675_v46 = vld [vmem:[%s2051_s10 + $0x50] sm:$0xff] }
 0x150   : > { %824 = vmatpush.bf16.msra.mxu1 %v1679_v28  ;;  %v1685_v39 = vld [vmem:[%s2051_s10 + $0xa0] sm:$0xff]  ;;  %v1684_v43 = vld [vmem:[%s2051_s10 + $0x98] sm:$0xff]  ;;  %v1683_v48 = vld [vmem:[%s2051_s10 + $0x90] sm:$0xff] }
 0x151   : > { %837 = vmatpush.bf16.msra.mxu2 %v1687_v31  ;;  %v1693_v40 = vld [vmem:[%s2056_s27 + $0x20] sm:$0xff]  ;;  %v1692_v44 = vld [vmem:[%s2056_s27 + $0x18] sm:$0xff]  ;;  %v1691_v49 = vld [vmem:[%s2056_s27 + $0x10] sm:$0xff] }
 0x152   : > { %1046 = vmatpush.bf16.msra.mxu3 %v1695_v32  ;;  %v1666_v50 = vld [vmem:[%s2051_s10 + $0x8] sm:$0xff]  ;;  %v1665_v57 = vld [vmem:[%s2051_s10] sm:$0xff]  ;;  %v1704_v59 = vld [vmem:[%s2056_s27 + $0x78] sm:$0xff] }
 0x153   : > { %812 = vmatpush.bf16.msra.mxu0 %v1670_v33  ;;  %v1674_v51 = vld [vmem:[%s2051_s10 + $0x48] sm:$0xff]  ;;  %v1673_v58 = vld [vmem:[%s2051_s10 + $0x40] sm:$0xff]  ;;  %v1712_v60 = vld [vmem:[%s2056_s27 + $0xb8] sm:$0xff] }
 0x154   : > { %825 = vmatpush.bf16.msra.mxu1 %v1678_v34  ;;  %v2138_v52 = vld [vmem:[#allocation3] sm:$0xff]  ;;  %v1681_v61 = vld [vmem:[%s2051_s10 + $0x80] sm:$0xff]  ;;  %vm2151_vm1 = vmpackc.low %vm1721_vm0, %vm1721_vm0 }
 0x155   : > { %838 = vmatpush.bf16.msra.mxu2 %v1686_v35  ;;  %v1682_v54 = vld [vmem:[%s2051_s10 + $0x88] sm:$0xff]  ;;  %v606_v55 = vrot.slane %v2138_v52, 7  ;;  %v609_v62 = vrot.slane %v2138_v52, 1  ;;  %v612_v0 = vpack.c.bf16 %v2138_v52, %v2138_v52  ;;  %v1689_v2 = vld [vmem:[%s2056_s27] sm:$0xff]  ;;  %v1703_v3 = vld [vmem:[%s2056_s27 + $0x70] sm:$0xff] }
 0x156   : > { %1047 = vmatpush.bf16.msra.mxu3 %v1694_v36  ;;  %v1690_v56 = vld [vmem:[%s2056_s27 + $0x8] sm:$0xff]  ;;  %v1711_v4 = vld [vmem:[%s2056_s27 + $0xb0] sm:$0xff]  ;;  %vm2160_vm3 = vmpackc.low %vm1722_vm2, %vm1722_vm2 }
 0x157   : > { %813 = vmatpush.bf16.msra.mxu0 %v1669_v37  ;;  %v1498_v63 = vpack.c.bf16 %v606_v55, %v606_v55  ;;  %v1503_v5 = vpack.c.bf16 %v609_v62, %v609_v62  ;;  %v1702_v7 = vld [vmem:[%s2056_s27 + $0x68] sm:$0xff]  ;;  %v1701_v9 = vld [vmem:[%s2056_s27 + $0x60] sm:$0xff]  ;;  %v1700_v11 = vld [vmem:[%s2056_s27 + $0x58] sm:$0xff] }
 0x158   : > { %826 = vmatpush.bf16.msra.mxu1 %v1677_v38  ;;  %v1710_v8 = vld [vmem:[%s2056_s27 + $0xa8] sm:$0xff]  ;;  %v1709_v10 = vld [vmem:[%s2056_s27 + $0xa0] sm:$0xff]  ;;  %v1708_v12 = vld [vmem:[%s2056_s27 + $0x98] sm:$0xff] }
 0x159   : > { %839 = vmatpush.bf16.msra.mxu2 %v1685_v39  ;;  %v1699_v13 = vld [vmem:[%s2056_s27 + $0x50] sm:$0xff]  ;;  %v1698_v15 = vld [vmem:[%s2056_s27 + $0x48] sm:$0xff]  ;;  %v1697_v17 = vld [vmem:[%s2056_s27 + $0x40] sm:$0xff] }
 0x15a   : > { %1048 = vmatpush.bf16.msra.mxu3 %v1693_v40  ;;  %v1707_v14 = vld [vmem:[%s2056_s27 + $0x90] sm:$0xff]  ;;  %v1706_v16 = vld [vmem:[%s2056_s27 + $0x88] sm:$0xff]  ;;  %v1705_v18 = vld [vmem:[%s2056_s27 + $0x80] sm:$0xff] }
 0x15b   : > { %814 = vmatpush.bf16.msra.mxu0 %v1668_v41  ;;  %v1797_v27 = vld [vmem:[%s434_s26] ss:$0 sm:$0xff] }
 0x15c   : > { %827 = vmatpush.bf16.msra.mxu1 %v1676_v42  ;;  %v1796_v38 = vld [vmem:[%s431_s30] ss:$0 sm:$0xff] }
 0x15d   : > { %840 = vmatpush.bf16.msra.mxu2 %v1684_v43 }
 0x15e   : > { %1049 = vmatpush.bf16.msra.mxu3 %v1692_v44 }
 0x15f   : > { %815 = vmatpush.bf16.msra.mxu0 %v1667_v45 }
 0x160   : > { %828 = vmatpush.bf16.msra.mxu1 %v1675_v46 }
 0x161   : > { %841 = vmatpush.bf16.msra.mxu2 %v1683_v48 }
 0x162   : > { %1050 = vmatpush.bf16.msra.mxu3 %v1691_v49 }
 0x163   : > { %816 = vmatpush.bf16.msra.mxu0 %v1666_v50 }
 0x164   : > { %829 = vmatpush.bf16.msra.mxu1 %v1674_v51 }
 0x165   : > { %842 = vmatpush.bf16.msra.mxu2 %v1682_v54 }
 0x166   : > { %1051 = vmatpush.bf16.msra.mxu3 %v1690_v56 }
 0x167   : > { %817 = vmatpush.bf16.msra.mxu0 %v1665_v57 }
 0x168   : > { %830 = vmatpush.bf16.msra.mxu1 %v1673_v58 }
 0x169   : > { %843 = vmatpush.bf16.msra.mxu2 %v1681_v61 }
 0x16a   : > { %1499 = vmatmul.msk.bf16.vlgmr.msra.gmra.mxu0 %vm2151_vm1, %v1498_v63  ;;  %1052 = vmatpush.bf16.msra.mxu3 %v1689_v2 }
 0x16b   : > { %1058 = vmatpush.bf16.msrb.mxu0 %v1704_v59  ;;  %831 = vmatmul.bf16.vlgmr.msra.gmra.mxu1 %v612_v0 }
 0x16c   : > { %1071 = vmatpush.bf16.msrb.mxu1 %v1712_v60  ;;  %1504 = vmatmul.msk.bf16.vlgmr.msra.gmra.mxu2 %vm2160_vm3, %v1503_v5 }
 0x16d   : > { %1605 = vmatmul.msk.bf16.vlgmr.msra.gmra.mxu3 %vm2151_vm1, %v1498_v63 }
 0x16f   : > { %1059 = vmatpush.bf16.msrb.mxu0 %v1703_v3 }
 0x170   : > { %1072 = vmatpush.bf16.msrb.mxu1 %v1711_v4 }
 0x173   : > { %1060 = vmatpush.bf16.msrb.mxu0 %v1702_v7 }
 0x174   : > { %1073 = vmatpush.bf16.msrb.mxu1 %v1710_v8 }
 0x177   : > { %1061 = vmatpush.bf16.msrb.mxu0 %v1701_v9 }
 0x178   : > { %1074 = vmatpush.bf16.msrb.mxu1 %v1709_v10 }
 0x17b   : > { %1062 = vmatpush.bf16.msrb.mxu0 %v1700_v11 }
 0x17c   : > { %1075 = vmatpush.bf16.msrb.mxu1 %v1708_v12 }
 0x17f   : > { %1063 = vmatpush.bf16.msrb.mxu0 %v1699_v13 }
 0x180   : > { %1076 = vmatpush.bf16.msrb.mxu1 %v1707_v14 }
 0x183   : > { %1064 = vmatpush.bf16.msrb.mxu0 %v1698_v15 }
 0x184   : > { %1077 = vmatpush.bf16.msrb.mxu1 %v1706_v16 }
 0x187   : > { %1065 = vmatpush.bf16.msrb.mxu0 %v1697_v17 }
 0x188   : > { %1078 = vmatpush.bf16.msrb.mxu1 %v1705_v18 }
 0x18a   : > { %1066 = vmatmul.bf16.vlgmr.msrb.gmra.mxu0 %v612_v0 }
 0x18b   : > { %1610 = vmatmul.msk.bf16.vlgmr.msrb.gmra.mxu1 %vm2160_vm3, %v1503_v5 }
 0x1e7   : > { %v819_v19 = vpop.f32.mrf.mxu0 }
 0x1e8   : > { %v832_v20 = vpop.f32.mrf.mxu1  ;;  %v820_v40 = vadd.f32 %v1796_v38, %v819_v19 }
 0x1ea   : > { %v833_v44 = vadd.f32 %v832_v20, %v820_v40 }
 0x1ef   : > { %v821_v21 = vpop.f32.mrf.mxu0  ;;  %v845_v23 = vpop.f32.mrf.mxu2 }
 0x1f0   : > { %v834_v22 = vpop.f32.mrf.mxu1  ;;  %v1054_v24 = vpop.f32.mrf.mxu3  ;;  %v846_v49 = vadd.f32 %v845_v23, %v833_v44 }
 0x1f1   : > { %v1055_v28 = vadd.f32 %v1797_v27, %v1054_v24 }
 0x1f7   : > { %v847_v25 = vpop.f32.mrf.mxu2 }
 0x1f8   : > { %v1056_v26 = vpop.f32.mrf.mxu3 }
 0x207   : > { %v1067_v29 = vpop.f32.mrf.mxu0 }
 0x208   : > { %v1080_v30 = vpop.f32.mrf.mxu1  ;;  %v1068_v31 = vadd.f32 %v1067_v29, %v1055_v28 }
 0x20a   : > { %v1081_v32 = vadd.f32 %v1080_v30, %v1068_v31 }
 0x20c   : > { %v1611_v33 = vmul.f32 -1.442695, %v1081_v32 }
 0x20e   : > { %1798 = vpow2.f32 %v1611_v33 }
 0x20f   : > { %v1069_v34 = vpop.f32.mrf.mxu0 }
 0x210   : > { %v1082_v35 = vpop.f32.mrf.mxu1 }
 0x214   : > { %v1799_v36 = vpop.eup %1798 }
 0x215   : > { %v1087_v37 = vadd.f32 1.0, %v1799_v36 }
 0x217   : > { %1800 = vrcp.f32 %v1087_v37  ;;  %v1099_v43 = vand.u32 2147483648, %v1087_v37  ;;  %v1097_v46 = vand.u32 2147483647, %v1087_v37  ;;  %vm1093_vm5 = vweird.f32 %v1087_v37 }
 0x219   : > { %v1100_v48 = vor.u32 1.1754944e-38, %v1099_v43  ;;  %vm1098_vm7 = vcmp.eq.f32.partialorder %v1097_v46, 8.507059e+37 }
 0x21d   : > { %v1801_v39 = vpop.eup %1800 }
 0x21e   : > { %v1089_v41 = vmul.f32 %v1801_v39, %v1087_v37  ;;  %vm1094_vm4 = vweird.f32 %v1801_v39 }
 0x21f   : > { %vm1095_vm6 = vmor %vm1093_vm5, %vm1094_vm4 }
 0x220   : > { %v1090_v42 = vsub.f32 1.0, %v1089_v41 }
 0x222   : > { %v1091_v45 = vmul.f32 %v1801_v39, %v1090_v42 }
 0x224   : > { %v1092_v47 = vadd.f32 %v1801_v39, %v1091_v45 }
 0x226   : > { %v1096_v50 = vsel %vm1095_vm6, %v1801_v39, %v1092_v47 }
 0x227   : > { %v1101_v51 = vsel %vm1098_vm7, %v1100_v48, %v1096_v50 }
 0x228   : > { %v1103_v53 = vmul.f32 %v1101_v51, %v846_v49 }
 0x22a   : > { %v1104_v54 = vadd.f32 %v1103_v53, %v2138_v52  ;;  %1110 = sbr.rel (%p1612_p1) target bundleno = 725 (0x2d5), region = 68 }
 0x22c   : > { %v1105_v55 = vmul.f32 0.70710677, %v1104_v54 }
 0x22e   : > { %1106 = vst [vmem:[#allocation3] sm:$0xff] %v1105_v55 }
 0x22f   : > { %v1720_v56 = vld [vmem:[%s2277_s8 + $0x38] sm:$0xff]  ;;  %v1719_v57 = vld [vmem:[%s2277_s8 + $0x30] sm:$0xff]  ;;  %v1718_v58 = vld [vmem:[%s2277_s8 + $0x28] sm:$0xff]  ;;  %v1111_v63 = vpack.c.bf16 %v1105_v55, %v1105_v55 }
 0x230   : > { %1180 = vmatpush.bf16.msra.mxu0 %v1720_v56  ;;  %v1717_v52 = vld [vmem:[%s2277_s8 + $0x20] sm:$0xff]  ;;  %v1716_v59 = vld [vmem:[%s2277_s8 + $0x18] sm:$0xff]  ;;  %v1715_v60 = vld [vmem:[%s2277_s8 + $0x10] sm:$0xff] }
 0x231   : > { %v1714_v61 = vld [vmem:[%s2277_s8 + $0x8] sm:$0xff]  ;;  %v1713_v62 = vld [vmem:[%s2277_s8] sm:$0xff] }
 0x232   : > { %v1802_v0 = vld [vmem:[%s2278_s9] ss:$0 sm:$0xff] }
 0x233   : > { %v1193_v2 = vld [vmem:[#allocation2] sm:$0xff] }
 0x234   : > { %1181 = vmatpush.bf16.msra.mxu0 %v1719_v57 }
 0x238   : > { %1182 = vmatpush.bf16.msra.mxu0 %v1718_v58 }
 0x23c   : > { %1183 = vmatpush.bf16.msra.mxu0 %v1717_v52 }
 0x240   : > { %1184 = vmatpush.bf16.msra.mxu0 %v1716_v59 }
 0x244   : > { %1185 = vmatpush.bf16.msra.mxu0 %v1715_v60 }
 0x248   : > { %1186 = vmatpush.bf16.msra.mxu0 %v1714_v61 }
 0x24c   : > { %1187 = vmatpush.bf16.msra.mxu0 %v1713_v62 }
 0x24f   : > { %1188 = vmatmul.bf16.vlgmr.msra.gmra.mxu0 %v1111_v63 }
 0x2cc   : > { %v1189_v1 = vpop.f32.mrf.mxu0 }
 0x2cd   : > { %v1190_v3 = vadd.f32 %v1802_v0, %v1189_v1 }
 0x2cf   : > { %v1194_v4 = vadd.f32 %v1193_v2, %v1190_v3 }
 0x2d1   : > { %v1195_v5 = vmul.f32 0.70710677, %v1194_v4 }
 0x2d3   : > { %1196 = vst [vmem:[%s414_s22] sm:$0xff] %v1195_v5 }
 0x2d4   : > { %v1191_v6 = vpop.f32.mrf.mxu0 }
 0x2d5 PF: > { %s1646_s21 = sshll.u32 %s1885_s17, 3  ;;  %s2310_s25 = sld [smem:[#allocation17_spill]] }
 0x2d6   : > { %s1210_s12 = sshll.u32 %s414_s22, 4  ;;  %s2311_s18 = sand.u32 1, %s1873_s14   ;;  %s1211_s12 = int_to_ptr.vmem [resolvable:$true] %s1210_s12 }
 0x2d7   : > { %s1198_s19 = scalar_lea.sflag [#allocation5], %s2311_s18 }
 0x2db   : > { %s1208_s28 = scalar_lea.hbm %s2310_s25, %s1646_s21  ;;  %s1823_s24 = scalar_lea.hbm %s2310_s25, 16 }
 0x2dc   : > { %s1212_s16 = sshll.u32 %s1208_s28, 4  ;;  %s1213_s16 = int_to_ptr.hbm [resolvable:$true] %s1212_s16 }
 0x2dd   : > { %s1817_s15 = sshra.s32 %s1213_s16, 4  ;;  %s1818_s15 = int_to_ptr.hbm [resolvable:$true] %s1817_s15 }
 0x2de   : > { %s1819_s29 = scalar_lea.hbm %s1818_s15, 8  ;;  %p1824_p6 = scmp.lt.s32.totalorder %s1818_s15, %s2310_s25 }
 0x2df   : > { %p1820_p2 = scmp.ne.s32.totalorder %s1818_s15, %s1819_s29  ;;  %p1825_p7 = scmp.lt.s32.totalorder %s1823_s24, %s1819_s29 }
 0x2e1   : > { %p1821_p4 = pnand %p1820_p2, %p2003_p3  ;;  %p1826_p8 = por %p1825_p7, %p1824_p6 }
 0x2e3   : > { %p1822_p5 = pneg %p1821_p4 }
 0x2e5   : > { %p1827_p10 = pnand %p1826_p8, %p1822_p5 }
 0x2e7   : > { %1830 = shalt.err (!%p1827_p10)
}
 0x2e8   : > { %1724 = dma.vmem_to_hbm [thread:$0]  (%p2003_p3), %s1211_s12, 128, %s1213_s16, %s1198_s19  }
 0x2e9 PF: > { %s2312_s11 = sld [smem:[#allocation11_spill]] }
 0x2ea   : > { %s2313_s22 = sld [smem:[#allocation7_spill]] }
 0x2ef   : > { %p1730_p11 = scmp.ge.s32.totalorder %s2312_s11, 2 }
 0x2f0   : > { %s1224_s21 = sand.u32 1, %s2313_s22  }
 0x2f1   : > { %p1727_p12 = pnand %p1730_p11, %p2013_p9  ;;  %s1225_s20 = scalar_lea.sflag [#allocation5], %s1224_s21 }
 0x2f3   : > { %p1728_p13 = pneg %p1727_p12 }
 0x2f5   : > { %1864 = dma.done.wait (%p1728_p13), %s1225_s20, 128  }
 0x2f6   : > { %1866 = vsyncadd (%p1728_p13), %s1225_s20, 4294967168  ;;  %s23_s20 = sadd.s32 1, %s2312_s11   ;;  %s2315_s23 = sld [smem:[#allocation8_spill]] }
 0x2f7   : > { %p20_p0 = scmp.ge.s32.totalorder %s23_s20, 6   ;;  %s2316_s15 = sld [smem:[#allocation16_spill]] }
 0x2f8   : > { %s2317_s16 = sld [smem:[#allocation9_spill]]  ;;  %s2321_s13 = smov %s1873_s14 }
 0x2f9   : > { %s2318_s17 = sld [smem:[#allocation10_spill]]  ;;  %22 = sbr.rel (!%p20_p0) target bundleno = 7 (0x7), region = 115 }
 0x2fa   : > { %s2319_s18 = sld [smem:[#allocation12_spill]] }
 0x2fb   : > { %s2320_s19 = sld [smem:[#allocation14_spill]] }
 0x2fc   : > { %s2322_s14 = smov %s2315_s23 }
 0x2fe   :  { %1231 = vsyncpa [#allocation5], 1 }
 0x2ff   :  { %1233 = vsyncpa [#allocation5 + $0x1], 1 }

</bundles_post_ra>
